<compile_context>
chip_gen: v7x
topology: tpu7x:2x2x1
jax: 0.10.0
libtpu: 0.0.40
codegen_flags: <defaults>
</compile_context>

<pallas_src>
import functools

import jax
import jax.numpy as jnp
from jax.experimental import pallas as pl
from jax.experimental.pallas import tpu as pltpu


def _ls_single_pass_kernel(pred_ref, tgt_ref, out_ref, *, off_val, coef):
    """Grid = (row_tiles,).  Full class dimension in one block."""
    x = pred_ref[...].astype(jnp.float32)              # (bn, C)
    tgt = tgt_ref[...]                                  # (bn, 1) int32
    bn, bc = x.shape

    m = jnp.max(x, axis=-1, keepdims=True)
    lse = m + jnp.log(jnp.sum(jnp.exp(x - m), axis=-1, keepdims=True))

    col = jax.lax.broadcasted_iota(jnp.int32, (bn, bc), 1)
    x_tgt = jnp.sum(jnp.where(col == tgt, x, 0.0), axis=-1, keepdims=True)
    sum_x = jnp.sum(x, axis=-1, keepdims=True)

    out_ref[...] = (lse - jnp.float32(off_val) * sum_x
                    - jnp.float32(coef) * x_tgt)


def _ls_class_tiled_kernel(pred_ref, tgt_ref, out_ref, m_sc, s_sc, w_sc, *,
                           off_val, coef):
    """Grid = (row_tiles ["parallel"], class_tiles ["arbitrary", last])."""
    j = pl.program_id(1)

    @pl.when(j == 0)
    def _():
        m_sc[...] = jnp.full_like(m_sc, -3.0e38)        # running row max
        s_sc[...] = jnp.zeros_like(s_sc)                # running sum exp(x-m)
        w_sc[...] = jnp.zeros_like(w_sc)                # running weighted sum

    x = pred_ref[...].astype(jnp.float32)               # (bn, bc)
    tgt = tgt_ref[...]                                   # (bn, 1) int32
    bn, bc = x.shape

    # Online log-sum-exp across class tiles.
    m_prev = m_sc[...]
    m_new = jnp.maximum(m_prev, jnp.max(x, axis=-1, keepdims=True))
    s_sc[...] = (s_sc[...] * jnp.exp(m_prev - m_new)
                 + jnp.sum(jnp.exp(x - m_new), axis=-1, keepdims=True))
    m_sc[...] = m_new

    # Running  off_val * sum_c(x) + coef * x[target]  (fused accumulator).
    col = jax.lax.broadcasted_iota(jnp.int32, (bn, bc), 1)
    x_tgt = jnp.sum(jnp.where(col == tgt - j * bc, x, 0.0),
                    axis=-1, keepdims=True)
    w_sc[...] += (jnp.float32(off_val) * jnp.sum(x, axis=-1, keepdims=True)
                  + jnp.float32(coef) * x_tgt)

    @pl.when(j == pl.num_programs(1) - 1)
    def _():
        out_ref[...] = m_sc[...] + jnp.log(s_sc[...]) - w_sc[...]


_TARGET_BLOCK_BYTES = 4 << 20    # pred bytes per block (x2 for double-buffer)
_SINGLE_PASS_LIMIT = 8 << 20     # dbl-buffered bytes of a min-height full-C tile


def _choose_block_c(C, block_c, itemsize, row_align):
    if block_c is not None:
        assert C % block_c == 0, "block_c must divide classes"
        assert block_c == C or block_c % 128 == 0, \
            "block_c must be a multiple of 128 (or equal to classes)"
        return block_c
    # Full-C row tiles whenever a double-buffered minimum-height tile is small
    # relative to VMEM; this covers every realistic class / vocab count.
    if C * itemsize * row_align * 2 <= _SINGLE_PASS_LIMIT:
        return C
    for cand in (2048, 1024, 512, 256, 128):
        if C % cand == 0:
            return cand
    return C  # huge C not a multiple of 128: one full-row tile (rare).


def label_smoothing_loss(pred, target, *, classes, smoothing=0.1,
                         block_n=None, block_c=None):
    """pred: (N, C) float32/bfloat16 logits; target: (N,) int class ids."""
    N, C = pred.shape
    assert C == classes
    confidence = 1.0 - smoothing
    off_val = smoothing / (classes - 1)
    coef = confidence - off_val

    itemsize = jnp.dtype(pred.dtype).itemsize
    row_align = 16 if itemsize == 2 else 8

    block_c = _choose_block_c(C, block_c, itemsize, row_align)
    num_ct = C // block_c

    # Row tile: ~4 MiB of pred so double-buffering overlaps DMA with compute.
    auto_bn = block_n is None
    if auto_bn:
        bn = _TARGET_BLOCK_BYTES // max(1, itemsize * block_c)
        block_n = max(row_align, (bn // row_align) * row_align)
    block_n = min(block_n, N)
    if block_n != N and block_n % row_align != 0:
        block_n = min(max(row_align, (block_n // row_align) * row_align), N)

    # Prefer a row tile that divides N (avoids padding the whole pred array).
    if N % block_n == 0:
        n_pad = N
    else:
        n_pad = None
        if auto_bn:
            d = (block_n // row_align) * row_align
            while d >= row_align and N % d != 0:
                d -= row_align
            if d >= row_align and N % d == 0:
                block_n, n_pad = d, N
        if n_pad is None:
            n_pad = pl.cdiv(N, block_n) * block_n

    tgt2d = target.astype(jnp.int32).reshape(N, 1)
    if n_pad != N:
        pred = jnp.pad(pred, ((0, n_pad - N), (0, 0)))
        tgt2d = jnp.pad(tgt2d, ((0, n_pad - N), (0, 0)))

    num_rt = n_pad // block_n
    cost = pl.CostEstimate(flops=8 * n_pad * C,
                           transcendentals=n_pad * C,
                           bytes_accessed=n_pad * C * itemsize + n_pad * 8)

    if num_ct == 1:
        kernel = functools.partial(_ls_single_pass_kernel,
                                   off_val=off_val, coef=coef)
        grid_spec = pltpu.PrefetchScalarGridSpec(
            num_scalar_prefetch=0,
            grid=(num_rt,),
            in_specs=[
                pl.BlockSpec((block_n, C), lambda i: (i, 0)),
                pl.BlockSpec((block_n, 1), lambda i: (i, 0)),
            ],
            out_specs=pl.BlockSpec((block_n, 1), lambda i: (i, 0)),
        )
        dim_sem = ("parallel",)
    else:
        kernel = functools.partial(_ls_class_tiled_kernel,
                                   off_val=off_val, coef=coef)
        grid_spec = pltpu.PrefetchScalarGridSpec(
            num_scalar_prefetch=0,
            grid=(num_rt, num_ct),
            in_specs=[
                pl.BlockSpec((block_n, block_c), lambda i, j: (i, j)),
                pl.BlockSpec((block_n, 1), lambda i, j: (i, 0)),
            ],
            out_specs=pl.BlockSpec((block_n, 1), lambda i, j: (i, 0)),
            scratch_shapes=[pltpu.VMEM((block_n, 1), jnp.float32)] * 3,
        )
        dim_sem = ("parallel", "arbitrary")

    per_row = pl.pallas_call(
        kernel,
        out_shape=jax.ShapeDtypeStruct((n_pad, 1), jnp.float32),
        grid_spec=grid_spec,
        compiler_params=pltpu.CompilerParams(dimension_semantics=dim_sem),
        cost_estimate=cost,
    )(pred, tgt2d)

    # TODO(synk): the final mean over the tiny (N, 1) per-row output is left
    # to XLA; it is negligible next to the (N, C) logits the kernel streams.
    return jnp.sum(per_row[:N, 0]) / jnp.float32(N)


def _reference(pred, target, classes, smoothing):
    logp = jax.nn.log_softmax(pred.astype(jnp.float32), axis=-1)
    n, c = pred.shape
    td = jnp.full((n, c), smoothing / (classes - 1), dtype=jnp.float32)
    td = td.at[jnp.arange(n), target].set(1.0 - smoothing)
    return jnp.mean(jnp.sum(-td * logp, axis=-1))


if __name__ == "__main__":
    key = jax.random.PRNGKey(0)
    k1, k2, k3, k4 = jax.random.split(key, 4)

    # Test 1: small shapes matching the module (batch=8, classes=16), defaults.
    pred1 = jax.random.normal(k1, (8, 16), dtype=jnp.float32)
    tgt1 = jax.random.randint(k2, (8,), 0, 16, dtype=jnp.int32)
    loss1 = jax.block_until_ready(
        label_smoothing_loss(pred1, tgt1, classes=16, smoothing=0.1))
    ref1 = _reference(pred1, tgt1, 16, 0.1)
    assert jnp.allclose(loss1, ref1, atol=1e-5, rtol=1e-5), (loss1, ref1)

    # Test 2: forced class tiling (online log-sum-exp path) + multiple row tiles.
    pred2 = jax.random.normal(k3, (32, 256), dtype=jnp.float32)
    tgt2 = jax.random.randint(k4, (32,), 0, 256, dtype=jnp.int32)
    loss2 = jax.block_until_ready(
        label_smoothing_loss(pred2, tgt2, classes=256, smoothing=0.1,
                             block_n=16, block_c=128))
    ref2 = _reference(pred2, tgt2, 256, 0.1)
    assert jnp.allclose(loss2, ref2, atol=1e-5, rtol=1e-5), (loss2, ref2)

    # Test 3: N not a multiple of the row tile (padding path).
    pred3 = jax.random.normal(k2, (10, 128), dtype=jnp.float32)
    tgt3 = jax.random.randint(k1, (10,), 0, 128, dtype=jnp.int32)
    loss3 = jax.block_until_ready(
        label_smoothing_loss(pred3, tgt3, classes=128, smoothing=0.1,
                             block_n=8))
    ref3 = _reference(pred3, tgt3, 128, 0.1)
    assert jnp.allclose(loss3, ref3, atol=1e-5, rtol=1e-5), (loss3, ref3)

    # Test 4: bf16 logits end-to-end (kernel upcasts internally).
    pred4 = jax.random.normal(k4, (16, 256), dtype=jnp.float32).astype(
        jnp.bfloat16)
    tgt4 = jax.random.randint(k3, (16,), 0, 256, dtype=jnp.int32)
    loss4 = jax.block_until_ready(
        label_smoothing_loss(pred4, tgt4, classes=256, smoothing=0.1))
    ref4 = _reference(pred4.astype(jnp.float32), tgt4, 256, 0.1)
    assert jnp.allclose(loss4, ref4, atol=1e-4, rtol=1e-4), (loss4, ref4)

    print("KERNEL_OK")
</pallas_src>

<mosaic_0001>
module attributes {stable_mosaic.version = 11 : i64} {
  func.func @_ls_single_pass_kernel(%arg0: i32, %arg1: memref<8x16xf32, #tpu.memory_space<vmem>>, %arg2: memref<8x1xi32, #tpu.memory_space<vmem>>, %arg3: memref<8x1xf32, #tpu.memory_space<vmem>>) attributes {dimension_semantics = [#tpu.dimension_semantics<parallel>], iteration_bounds = array<i64: 1>, scalar_prefetch = 0 : i64, scratch_operands = 0 : i64, tpu.core_type = #tpu.core_type<tc>, window_params = [{transform_indices = @transform_0, window_bounds = array<i64: 8, 16>}, {transform_indices = @transform_1, window_bounds = array<i64: 8, 1>}, {transform_indices = @transform_2, window_bounds = array<i64: 8, 1>}]} {
    %c0 = arith.constant 0 : index
    %c0_0 = arith.constant 0 : index
    %0 = vector.load %arg1[%c0, %c0_0] : memref<8x16xf32, #tpu.memory_space<vmem>>, vector<8x16xf32>
    %c0_1 = arith.constant 0 : index
    %c0_2 = arith.constant 0 : index
    %1 = vector.load %arg2[%c0_1, %c0_2] : memref<8x1xi32, #tpu.memory_space<vmem>>, vector<8x1xi32>
    %cst = arith.constant dense<0xFF800000> : vector<8xf32>
    %2 = vector.multi_reduction <maximumf>, %0, %cst [1] : vector<8x16xf32> to vector<8xf32>
    %3 = vector.shape_cast %2 : vector<8xf32> to vector<8x1xf32>
    %4 = vector.broadcast %3 : vector<8x1xf32> to vector<8x16xf32>
    %5 = arith.subf %0, %4 : vector<8x16xf32>
    %6 = math.exp %5 : vector<8x16xf32>
    %cst_3 = arith.constant dense<0.000000e+00> : vector<8xf32>
    %7 = vector.multi_reduction <add>, %6, %cst_3 [1] : vector<8x16xf32> to vector<8xf32>
    %8 = vector.shape_cast %7 : vector<8xf32> to vector<8x1xf32>
    %9 = math.log %8 : vector<8x1xf32>
    %10 = arith.addf %3, %9 : vector<8x1xf32>
    %11 = tpu.iota {dimensions = array<i32: 1>} : vector<8x16xi32>
    %12 = vector.broadcast %1 : vector<8x1xi32> to vector<8x16xi32>
    %13 = arith.cmpi eq, %11, %12 : vector<8x16xi32>
    %cst_4 = arith.constant 0.000000e+00 : f32
    %14 = vector.broadcast %cst_4 : f32 to vector<8x16xf32>
    %15 = arith.select %13, %0, %14 : vector<8x16xi1>, vector<8x16xf32>
    %cst_5 = arith.constant dense<0.000000e+00> : vector<8xf32>
    %16 = vector.multi_reduction <add>, %15, %cst_5 [1] : vector<8x16xf32> to vector<8xf32>
    %17 = vector.shape_cast %16 : vector<8xf32> to vector<8x1xf32>
    %cst_6 = arith.constant dense<0.000000e+00> : vector<8xf32>
    %18 = vector.multi_reduction <add>, %0, %cst_6 [1] : vector<8x16xf32> to vector<8xf32>
    %19 = vector.shape_cast %18 : vector<8xf32> to vector<8x1xf32>
    %cst_7 = arith.constant 0.00666666683 : f32
    %20 = vector.broadcast %cst_7 : f32 to vector<8x1xf32>
    %21 = arith.mulf %20, %19 : vector<8x1xf32>
    %22 = arith.subf %10, %21 : vector<8x1xf32>
    %cst_8 = arith.constant 0.893333315 : f32
    %23 = vector.broadcast %cst_8 : f32 to vector<8x1xf32>
    %24 = arith.mulf %23, %17 : vector<8x1xf32>
    %25 = arith.subf %22, %24 : vector<8x1xf32>
    %c0_9 = arith.constant 0 : index
    %c0_10 = arith.constant 0 : index
    %26 = vector.load %arg3[%c0_9, %c0_10] : memref<8x1xf32, #tpu.memory_space<vmem>>, vector<8x1xf32>
    tpu.vector_store %arg3[%c0_9, %c0_10], %25 {strides = array<i32>} : memref<8x1xf32, #tpu.memory_space<vmem>>, vector<8x1xf32>,
    return
  }
  func.func @transform_0(%arg0: i32) -> (i32, i32) {
    %c0_i32 = arith.constant 0 : i32
    %c0_i32_0 = arith.constant 0 : i32
    return %arg0, %c0_i32 : i32, i32
  }
  func.func @transform_1(%arg0: i32) -> (i32, i32) {
    %c0_i32 = arith.constant 0 : i32
    %c0_i32_0 = arith.constant 0 : i32
    return %arg0, %c0_i32 : i32, i32
  }
  func.func @transform_2(%arg0: i32) -> (i32, i32) {
    %c0_i32 = arith.constant 0 : i32
    %c0_i32_0 = arith.constant 0 : i32
    return %arg0, %c0_i32 : i32, i32
  }
}

</mosaic_0001>

<bundles_post_ra>
// kernel: tpu_custom_call.1
= control target key start
LH: loop header
LB: loop body
LE: loop exit
PB: predicated region body
PF: predicated region fallthrough
CT: control target
= control target key end

     0   :  { %vm13_vm0 = vcmask 130048   ;;  %v55_v1 = vmov 0   ;;  %v26_v7 = vlaneseq  ;;  %vm43_vm2 = vcmask 7168   ;;  %s84_s0 = inlined_call_operand.vmem [shape: f32[8,16], index: 0, kind: input, shape index: {}]   ;;  %s85_s1 = inlined_call_operand.vmem [shape: s32[8,1], index: 1, kind: input, shape index: {}]   ;;  %s86_s2 = inlined_call_operand.vmem [shape: f32[8,1], index: 2, kind: output, shape index: {}]  }
   0x1   :  { %v11_v0 = vld [vmem:[%s84_s0] sm:$0xff]  ;;  %50 = vset.pattern.permute.xlu0 %v55_v1 }
   0x2   :  { %v14_v2 = vsel %vm13_vm0, %v11_v0, -inf  ;;  %v12_v3 = vld [vmem:[%s85_s1] sm:$0xff]  ;;  %v27_v8 = vand.u32 127, %v26_v7  ;;  %v36_v12 = vsel %vm13_vm0, %v11_v0, 0.0 }
   0x3   :  { %15 = vmax.xlane.f32.xlu0 %v14_v2 }
  0x19   :  { %29 = vperm.xlu0 %50, %v12_v3  }
  0x90   :  { %v16_v4 = vpop.xlane.xlu0 %15 }
  0x91   :  { %v17_v5 = vsub.f32 %v11_v0, %v16_v4 }
  0x93   :  { %v18_v6 = vmul.f32 1.442695, %v17_v5 }
  0x95   :  { %51 = vpow2.f32 %v18_v6 }
  0x98   :  { %v30_v9 = vpop.permute.xlu0 %29 }
  0x99   :  { %vm31_vm1 = vcmp.eq.s32.totalorder %v27_v8, %v30_v9 }
  0x9a   :  { %v32_v13 = vsel %vm31_vm1, %v11_v0, 0.0 }
  0x9b   :  { %v33_v14 = vsel %vm13_vm0, %v32_v13, 0.0 }
  0x9f   :  { %v52_v10 = vpop.eup %51 }
  0xa0   :  { %v20_v11 = vsel %vm13_vm0, %v52_v10, 0.0 }
  0xa1   :  { %21 = vadd.xlane.f32.xlu1 %v20_v11 }
  0xa5   :  { %37 = vadd.xlane.f32.xlu1 %v36_v12 }
  0xa9   :  { %34 = vadd.xlane.f32.xlu1 %v33_v14 }
 0x12e   :  { %v22_v15 = vpop.xlane.xlu1 %21 }
 0x12f   :  { %53 = vlog2.f32 %v22_v15 }
 0x132   :  { %v38_v16 = vpop.xlane.xlu1 %37 }
 0x133   :  { %v39_v21 = vmul.f32 0.006666667, %v38_v16 }
 0x136   :  { %v35_v18 = vpop.xlane.xlu1 %34 }
 0x137   :  { %v41_v22 = vmul.f32 0.8933333, %v35_v18 }
 0x139   :  { %v54_v17 = vpop.eup %53 }
 0x13a   :  { %v24_v19 = vmul.f32 0.6931472, %v54_v17 }
 0x13c   :  { %v25_v20 = vadd.f32 %v24_v19, %v16_v4 }
 0x13e   :  { %v40_v23 = vsub.f32 %v25_v20, %v39_v21 }
 0x140   :  { %v42_v24 = vsub.f32 %v40_v23, %v41_v22 }
 0x142   :  { %44 = vst.msk [vmem:[%s86_s2] sm:$0xff] %vm43_vm2, %v42_v24 }

</bundles_post_ra>
